<compile_context>
chip_gen: v6e
topology: v6e:2x2x1
jax: 0.10.0
libtpu: 0.0.40
codegen_flags: <defaults>
</compile_context>

<pallas_src>
import functools

import jax
import jax.numpy as jnp
from jax.experimental import pallas as pl
from jax.experimental.pallas import tpu as pltpu


# ----------------------------------------------------------------------------
# Kernel 1: LayerNorm -> q0/k projection (head 0) -> scaled dots -> softmax
# ----------------------------------------------------------------------------
def _attn_weights_kernel(x_ref, gamma_ref, beta_ref, wq_ref, wk_ref, attn_ref,
                         *, scale, eps):
    x = x_ref[...].astype(jnp.float32)                        # [n, dim]
    # nn.LayerNorm: biased variance over the last dim, eps inside rsqrt
    mu = jnp.mean(x, axis=-1, keepdims=True)
    var = jnp.mean((x - mu) ** 2, axis=-1, keepdims=True)
    xn = (x - mu) * jax.lax.rsqrt(var + eps)
    xn = xn * gamma_ref[...] + beta_ref[...]                   # [n, dim]

    # Only batch 0 / head 0 / query 0 of the logits are used downstream, so
    # project just query row 0 against the head-0 weight slice.
    q0 = jnp.dot(xn[0:1, :], wq_ref[...].astype(jnp.float32),
                 preferred_element_type=jnp.float32)           # [1, dh]
    k = jnp.dot(xn, wk_ref[...].astype(jnp.float32),
                preferred_element_type=jnp.float32)            # [n, dh]
    dots = jnp.dot(q0, k.T, preferred_element_type=jnp.float32) * scale  # [1, n]

    m = jnp.max(dots, axis=-1, keepdims=True)
    e = jnp.exp(dots - m)
    attn_ref[...] = e / jnp.sum(e, axis=-1, keepdims=True)     # [1, n]


# ----------------------------------------------------------------------------
# Kernel 2: o = sum_i attn[0, i] * v_i   (VPU weighted sum, f32 accumulation)
# ----------------------------------------------------------------------------
def _weighted_sum_kernel(attn_ref, *refs):
    *v_refs, o_ref = refs
    acc = v_refs[0][...].astype(jnp.float32) * attn_ref[0, 0]
    for i in range(1, len(v_refs)):                            # unrolled over n
        acc = acc + v_refs[i][...].astype(jnp.float32) * attn_ref[0, i]
    o_ref[...] = acc.astype(o_ref.dtype)


def _choose_v_tiling(L, n, itemsize, vmem_budget_bytes):
    """Lane-dense 2D view [rows, cols] (cols % 128 == 0) of a flat length-L
    volume, plus a row-block size tr dividing rows such that the (n + 1)
    double-buffered (tr, cols) blocks fit in `vmem_budget_bytes`."""
    if L % 128 != 0:
        # Fallback: one full-width block.  Correct, just not lane-tuned.
        return 1, L, 1
    cols = 128
    while cols * 2 <= 8192 and L % (cols * 2) == 0:
        cols *= 2
    rows = L // cols
    max_tr = max(1, vmem_budget_bytes // (2 * (n + 1) * cols * itemsize))
    if rows <= max_tr:
        return rows, cols, rows
    tr = (max_tr // 8) * 8
    while tr >= 8 and rows % tr != 0:
        tr -= 8
    if tr < 8:
        # TODO(synk): masked last block when `rows` has no sublane-aligned
        # divisor within the budget; fall back to a single (large) block.
        tr = rows
    return rows, cols, tr


def attention_forward(x, orig_x, gamma, beta, wq, wk, *, heads, dim_head,
                      vmem_budget_bytes=8 * 1024 * 1024):
    """Pallas implementation of Attention.forward(x, orig_x).

    Like the PyTorch module, only batch 0 / head 0 / query 0 of the attention
    logits contribute to the output; other batches/heads of `x` are ignored.
    """
    b, n, dim = x.shape
    assert len(orig_x) == n, "need one orig_x volume per frame"
    del heads  # only head 0 is used by the reference forward
    scale = float(dim_head) ** -0.5

    # ---- Kernel 1: attention weights over the n frames (negligible work) ----
    x0 = x[0]
    gamma2 = gamma.reshape(1, dim).astype(jnp.float32)
    beta2 = beta.reshape(1, dim).astype(jnp.float32)
    wq_h0 = wq[:, :dim_head]                 # head-0 slice only
    wk_h0 = wk[:, :dim_head]

    attn = pl.pallas_call(
        functools.partial(_attn_weights_kernel, scale=scale, eps=1e-5),
        out_shape=jax.ShapeDtypeStruct((1, n), jnp.float32),
        grid=(1,),
        in_specs=[
            pl.BlockSpec((n, dim), lambda i: (0, 0)),
            pl.BlockSpec((1, dim), lambda i: (0, 0)),
            pl.BlockSpec((1, dim), lambda i: (0, 0)),
            pl.BlockSpec((dim, dim_head), lambda i: (0, 0)),
            pl.BlockSpec((dim, dim_head), lambda i: (0, 0)),
        ],
        out_specs=pl.BlockSpec((1, n), lambda i: (0, 0)),
    )(x0, gamma2, beta2, wq_h0, wk_h0)

    # ---- Kernel 2: ret = sum_i attn[i] * orig_x[i]  (HBM-bandwidth bound) ---
    B, C, H, W = orig_x[0].shape
    L = B * C * H * W
    v_dtype = orig_x[0].dtype
    rows, cols, tr = _choose_v_tiling(L, n, jnp.dtype(v_dtype).itemsize,
                                      vmem_budget_bytes)

    # Lane-dense 2D views; no jnp.stack materialization of the whole v tensor,
    # and no host-side dtype up-cast (cast happens post-DMA inside the kernel).
    v2d = [v.reshape(rows, cols) for v in orig_x]

    v_spec = pl.BlockSpec((tr, cols), lambda j: (j, 0))
    out_flat = pl.pallas_call(
        _weighted_sum_kernel,
        out_shape=jax.ShapeDtypeStruct((rows, cols), v_dtype),
        grid=(rows // tr,),
        in_specs=[pl.BlockSpec(memory_space=pltpu.MemorySpace.SMEM)]  # attn
                 + [v_spec] * n,
        out_specs=pl.BlockSpec((tr, cols), lambda j: (j, 0)),
        compiler_params=pltpu.CompilerParams(
            dimension_semantics=("parallel",)),
    )(attn, *v2d)

    return out_flat.reshape(B, C, H, W)


# ----------------------------------------------------------------------------
# Pure-JAX reference (mirrors the PyTorch forward exactly)
# ----------------------------------------------------------------------------
def attention_ref(x, orig_x, gamma, beta, wq, wk, *, heads, dim_head):
    eps = 1e-5
    b, n, dim = x.shape
    mu = x.mean(-1, keepdims=True)
    var = ((x - mu) ** 2).mean(-1, keepdims=True)
    xn = (x - mu) / jnp.sqrt(var + eps) * gamma + beta
    q = xn @ wq                                                # [b, n, inner]
    k = xn @ wk
    q = q.reshape(b, n, heads, dim_head).transpose(0, 2, 1, 3)  # [b, h, n, d]
    k = k.reshape(b, n, heads, dim_head).transpose(0, 2, 1, 3)
    dots = jnp.einsum('bhnd,bhmd->bhnm', q, k) * (dim_head ** -0.5)
    attn = jax.nn.softmax(dots, axis=-1)[0, 0, 0]              # [n]
    v = jnp.stack(orig_x, axis=1)                              # [B, n, C, H, W]
    return (v * attn.reshape(1, -1, 1, 1, 1)).sum(axis=1)      # [B, C, H, W]


if __name__ == "__main__":
    key = jax.random.PRNGKey(0)

    # Small shapes consistent with the module.
    b, n, dim = 1, 8, 32          # x: [b, n, dim] sequence of clip features
    heads, dim_head = 1, 32       # to_qk: Linear(dim, 2 * heads * dim_head)
    B, C, H, W = 2, 4, 16, 16     # orig_x: list of n tensors [B, C, H, W]

    kx, kg, kb, kwq, kwk, kv = jax.random.split(key, 6)
    x = jax.random.normal(kx, (b, n, dim), dtype=jnp.float32)
    gamma = 1.0 + 0.1 * jax.random.normal(kg, (dim,), dtype=jnp.float32)
    beta = 0.1 * jax.random.normal(kb, (dim,), dtype=jnp.float32)
    # to_qk weight [2*inner, dim]; chunk(2, dim=-1) -> wq = W[:inner].T, wk = W[inner:].T
    inner = heads * dim_head
    wq = 0.05 * jax.random.normal(kwq, (dim, inner), dtype=jnp.float32)
    wk = 0.05 * jax.random.normal(kwk, (dim, inner), dtype=jnp.float32)
    orig_x = [
        jax.random.normal(k, (B, C, H, W), dtype=jnp.float32)
        for k in jax.random.split(kv, n)
    ]

    out = attention_forward(x, orig_x, gamma, beta, wq, wk,
                            heads=heads, dim_head=dim_head)
    out = jax.block_until_ready(out)

    ref = attention_ref(x, orig_x, gamma, beta, wq, wk,
                        heads=heads, dim_head=dim_head)
    assert out.shape == (B, C, H, W)
    assert jnp.allclose(out, ref, atol=1e-4, rtol=1e-4), \
        f"max err {jnp.max(jnp.abs(out - ref))}"

    print("KERNEL_OK")
</pallas_src>

<mosaic_0001>
module attributes {stable_mosaic.version = 11 : i64} {
  func.func @_attn_weights_kernel(%arg0: i32, %arg1: memref<8x32xf32, #tpu.memory_space<vmem>>, %arg2: memref<1x32xf32, #tpu.memory_space<vmem>>, %arg3: memref<1x32xf32, #tpu.memory_space<vmem>>, %arg4: memref<32x32xf32, #tpu.memory_space<vmem>>, %arg5: memref<32x32xf32, #tpu.memory_space<vmem>>, %arg6: memref<1x8xf32, #tpu.memory_space<vmem>>) attributes {dimension_semantics = [#tpu.dimension_semantics<arbitrary>], iteration_bounds = array<i64: 1>, scalar_prefetch = 0 : i64, scratch_operands = 0 : i64, tpu.core_type = #tpu.core_type<tc>, window_params = [{pipeline_mode = #tpu.pipeline_mode<synchronous>, transform_indices = @transform_0, window_bounds = array<i64: 8, 32>}, {pipeline_mode = #tpu.pipeline_mode<synchronous>, transform_indices = @transform_1, window_bounds = array<i64: 1, 32>}, {pipeline_mode = #tpu.pipeline_mode<synchronous>, transform_indices = @transform_2, window_bounds = array<i64: 1, 32>}, {pipeline_mode = #tpu.pipeline_mode<synchronous>, transform_indices = @transform_3, window_bounds = array<i64: 32, 32>}, {pipeline_mode = #tpu.pipeline_mode<synchronous>, transform_indices = @transform_4, window_bounds = array<i64: 32, 32>}, {pipeline_mode = #tpu.pipeline_mode<synchronous>, transform_indices = @transform_5, window_bounds = array<i64: 1, 8>}]} {
    %c0 = arith.constant 0 : index
    %c0_0 = arith.constant 0 : index
    %0 = vector.load %arg1[%c0, %c0_0] : memref<8x32xf32, #tpu.memory_space<vmem>>, vector<8x32xf32>
    %cst = arith.constant dense<0.000000e+00> : vector<8xf32>
    %1 = vector.multi_reduction <add>, %0, %cst [1] : vector<8x32xf32> to vector<8xf32>
    %2 = vector.shape_cast %1 : vector<8xf32> to vector<8x1xf32>
    %cst_1 = arith.constant 3.200000e+01 : f32
    %3 = vector.broadcast %cst_1 : f32 to vector<8x1xf32>
    %4 = arith.divf %2, %3 : vector<8x1xf32>
    %5 = vector.broadcast %4 : vector<8x1xf32> to vector<8x32xf32>
    %6 = arith.subf %0, %5 : vector<8x32xf32>
    %7 = arith.mulf %6, %6 : vector<8x32xf32>
    %cst_2 = arith.constant dense<0.000000e+00> : vector<8xf32>
    %8 = vector.multi_reduction <add>, %7, %cst_2 [1] : vector<8x32xf32> to vector<8xf32>
    %9 = vector.shape_cast %8 : vector<8xf32> to vector<8x1xf32>
    %cst_3 = arith.constant 3.200000e+01 : f32
    %10 = vector.broadcast %cst_3 : f32 to vector<8x1xf32>
    %11 = arith.divf %9, %10 : vector<8x1xf32>
    %12 = vector.broadcast %4 : vector<8x1xf32> to vector<8x32xf32>
    %13 = arith.subf %0, %12 : vector<8x32xf32>
    %cst_4 = arith.constant 9.99999974E-6 : f32
    %14 = vector.broadcast %cst_4 : f32 to vector<8x1xf32>
    %15 = arith.addf %11, %14 : vector<8x1xf32>
    %16 = math.rsqrt %15 : vector<8x1xf32>
    %17 = vector.broadcast %16 : vector<8x1xf32> to vector<8x32xf32>
    %18 = arith.mulf %13, %17 : vector<8x32xf32>
    %c0_5 = arith.constant 0 : index
    %c0_6 = arith.constant 0 : index
    %19 = vector.load %arg2[%c0_5, %c0_6] : memref<1x32xf32, #tpu.memory_space<vmem>>, vector<1x32xf32>
    %20 = vector.broadcast %19 : vector<1x32xf32> to vector<8x32xf32>
    %21 = arith.mulf %18, %20 : vector<8x32xf32>
    %c0_7 = arith.constant 0 : index
    %c0_8 = arith.constant 0 : index
    %22 = vector.load %arg3[%c0_7, %c0_8] : memref<1x32xf32, #tpu.memory_space<vmem>>, vector<1x32xf32>
    %23 = vector.broadcast %22 : vector<1x32xf32> to vector<8x32xf32>
    %24 = arith.addf %21, %23 : vector<8x32xf32>
    %25 = vector.extract_strided_slice %24 {offsets = [0, 0], sizes = [1, 32], strides = [1, 1]} : vector<8x32xf32> to vector<1x32xf32>
    %c0_9 = arith.constant 0 : index
    %c0_10 = arith.constant 0 : index
    %26 = vector.load %arg4[%c0_9, %c0_10] : memref<32x32xf32, #tpu.memory_space<vmem>>, vector<32x32xf32>
    %cst_11 = arith.constant dense<0.000000e+00> : vector<1x32xf32>
    %27 = tpu.matmul %25, %26, %cst_11 {dimension_numbers = #tpu.dot_dimension_numbers<[1], [0], [0], [1], [0, 0, 1, 1], [], []>} : vector<1x32xf32>, vector<32x32xf32>, vector<1x32xf32> -> vector<1x32xf32>
    %c0_12 = arith.constant 0 : index
    %c0_13 = arith.constant 0 : index
    %28 = vector.load %arg5[%c0_12, %c0_13] : memref<32x32xf32, #tpu.memory_space<vmem>>, vector<32x32xf32>
    %cst_14 = arith.constant dense<0.000000e+00> : vector<8x32xf32>
    %29 = tpu.matmul %24, %28, %cst_14 {dimension_numbers = #tpu.dot_dimension_numbers<[1], [0], [0], [1], [0, 0, 1, 1], [], []>} : vector<8x32xf32>, vector<32x32xf32>, vector<8x32xf32> -> vector<8x32xf32>
    %30 = tpu.transpose %29, [1, 0] : vector<8x32xf32> -> vector<32x8xf32>
    %cst_15 = arith.constant dense<0.000000e+00> : vector<1x8xf32>
    %31 = tpu.matmul %27, %30, %cst_15 {dimension_numbers = #tpu.dot_dimension_numbers<[1], [0], [0], [1], [0, 0, 1, 1], [], []>} : vector<1x32xf32>, vector<32x8xf32>, vector<1x8xf32> -> vector<1x8xf32>
    %cst_16 = arith.constant 0.176776692 : f32
    %32 = vector.broadcast %cst_16 : f32 to vector<1x8xf32>
    %33 = arith.mulf %31, %32 : vector<1x8xf32>
    %cst_17 = arith.constant dense<0xFF800000> : vector<1xf32>
    %34 = vector.multi_reduction <maximumf>, %33, %cst_17 [1] : vector<1x8xf32> to vector<1xf32>
    %35 = vector.shape_cast %34 : vector<1xf32> to vector<1x1xf32>
    %36 = vector.broadcast %35 : vector<1x1xf32> to vector<1x8xf32>
    %37 = arith.subf %33, %36 : vector<1x8xf32>
    %38 = math.exp %37 : vector<1x8xf32>
    %cst_18 = arith.constant dense<0.000000e+00> : vector<1xf32>
    %39 = vector.multi_reduction <add>, %38, %cst_18 [1] : vector<1x8xf32> to vector<1xf32>
    %40 = vector.shape_cast %39 : vector<1xf32> to vector<1x1xf32>
    %41 = vector.broadcast %40 : vector<1x1xf32> to vector<1x8xf32>
    %42 = arith.divf %38, %41 : vector<1x8xf32>
    %c0_19 = arith.constant 0 : index
    %c0_20 = arith.constant 0 : index
    %43 = vector.load %arg6[%c0_19, %c0_20] : memref<1x8xf32, #tpu.memory_space<vmem>>, vector<1x8xf32>
    tpu.vector_store %arg6[%c0_19, %c0_20], %42 {strides = array<i32>} : memref<1x8xf32, #tpu.memory_space<vmem>>, vector<1x8xf32>,
    return
  }
  func.func @transform_0(%arg0: i32) -> (i32, i32) {
    %c0_i32 = arith.constant 0 : i32
    %c0_i32_0 = arith.constant 0 : i32
    %c0_i32_1 = arith.constant 0 : i32
    return %c0_i32, %c0_i32_0 : i32, i32
  }
  func.func @transform_1(%arg0: i32) -> (i32, i32) {
    %c0_i32 = arith.constant 0 : i32
    %c0_i32_0 = arith.constant 0 : i32
    %c0_i32_1 = arith.constant 0 : i32
    return %c0_i32, %c0_i32_0 : i32, i32
  }
  func.func @transform_2(%arg0: i32) -> (i32, i32) {
    %c0_i32 = arith.constant 0 : i32
    %c0_i32_0 = arith.constant 0 : i32
    %c0_i32_1 = arith.constant 0 : i32
    return %c0_i32, %c0_i32_0 : i32, i32
  }
  func.func @transform_3(%arg0: i32) -> (i32, i32) {
    %c0_i32 = arith.constant 0 : i32
    %c0_i32_0 = arith.constant 0 : i32
    %c0_i32_1 = arith.constant 0 : i32
    return %c0_i32, %c0_i32_0 : i32, i32
  }
  func.func @transform_4(%arg0: i32) -> (i32, i32) {
    %c0_i32 = arith.constant 0 : i32
    %c0_i32_0 = arith.constant 0 : i32
    %c0_i32_1 = arith.constant 0 : i32
    return %c0_i32, %c0_i32_0 : i32, i32
  }
  func.func @transform_5(%arg0: i32) -> (i32, i32) {
    %c0_i32 = arith.constant 0 : i32
    %c0_i32_0 = arith.constant 0 : i32
    %c0_i32_1 = arith.constant 0 : i32
    return %c0_i32, %c0_i32_0 : i32, i32
  }
}

</mosaic_0001>

<bundles_post_ra>
// kernel: tpu_custom_call.1
= control target key start
LH: loop header
LB: loop body
LE: loop exit
PB: predicated region body
PF: predicated region fallthrough
CT: control target
= control target key end

     0   :  { %10 = vsyncpa [#allocation3], 0  ;;  %s562_s0 = inlined_call_operand.hbm [shape: f32[8,32], index: 0, kind: input, shape index: {}]   ;;  %s563_s1 = inlined_call_operand.vmem [shape: f32[1,32], index: 1, kind: input, shape index: {}]   ;;  %s564_s2 = inlined_call_operand.vmem [shape: f32[1,32], index: 2, kind: input, shape index: {}]   ;;  %s565_s3 = inlined_call_operand.hbm [shape: f32[32,32], index: 3, kind: input, shape index: {}]   ;;  %s566_s4 = inlined_call_operand.hbm [shape: f32[32,32], index: 4, kind: input, shape index: {}]   ;;  %s567_s5 = inlined_call_operand.hbm [shape: f32[1,8], index: 5, kind: output, shape index: {}]  }
   0x1   :  { %11 = vsyncpa [#allocation6], 0 }
   0x2   :  { %12 = vsyncpa [#allocation4], 0  ;;  %s494_s18 = smov [#allocation5]  }
   0x3   :  { %s32_s19 = sshll.u32 %s494_s18, 4  ;;  %s33_s19 = int_to_ptr.vmem [resolvable:$true] %s32_s19 }
   0x4   :  { %s416_s20 = scalar_lea.vmem %s33_s19, 512  ;;  %p421_p1 = scmp.lt.s32.totalorder %s33_s19, %s33_s19 }
   0x5   :  { %p417_p0 = scmp.ne.s32.totalorder %s33_s19, %s416_s20  ;;  %p422_p2 = scmp.lt.s32.totalorder %s416_s20, %s416_s20 }
   0x7   :  { %p423_p3 = por %p422_p2, %p421_p1 }
   0x9   :  { %p424_p4 = pnand %p423_p3, %p417_p0 }
   0xb   :  { %427 = shalt.err (!%p424_p4)
}
   0xc   :  { %s495_s21 = smov 128   ;;  %s496_s22 = smov 8  }
   0xd   :  { %38 = dma.hbm_to_vmem [thread:$0]  %s565_s3, 512, %s33_s19, [#allocation6], %s495_s21, %s495_s21, %s496_s22  }
   0xe   :  { %s497_s25 = smov [#allocation2]   ;;  %s498_s27 = smov [#allocation7]  }
   0xf   :  { %s19_s26 = sshll.u32 %s497_s25, 4  ;;  %s44_s28 = sshll.u32 %s498_s27, 4  ;;  %s20_s26 = int_to_ptr.vmem [resolvable:$true] %s19_s26  ;;  %s45_s28 = int_to_ptr.vmem [resolvable:$true] %s44_s28 }
  0x10   :  { %s436_s29 = scalar_lea.vmem %s20_s26, 128  ;;  %p441_p6 = scmp.lt.s32.totalorder %s20_s26, %s20_s26 }
  0x11   :  { %p437_p5 = scmp.ne.s32.totalorder %s20_s26, %s436_s29  ;;  %p442_p7 = scmp.lt.s32.totalorder %s436_s29, %s436_s29 }
  0x13   :  { %p443_p8 = por %p442_p7, %p441_p6 }
  0x15   :  { %p444_p9 = pnand %p443_p8, %p437_p5 }
  0x17   :  { %447 = shalt.err (!%p444_p9)
}
  0x18   :  { %22 = dma.hbm_to_vmem [thread:$0]  %s562_s0, 128, %s20_s26, [#allocation3]  }
  0x19   :  { %s456_s7 = scalar_lea.vmem %s45_s28, 512  ;;  %p461_p11 = scmp.lt.s32.totalorder %s45_s28, %s45_s28 }
  0x1a   :  { %p457_p10 = scmp.ne.s32.totalorder %s45_s28, %s456_s7  ;;  %p462_p12 = scmp.lt.s32.totalorder %s456_s7, %s456_s7 }
  0x1c   :  { %p463_p13 = por %p462_p12, %p461_p11 }
  0x1e   :  { %p464_p0 = pnand %p463_p13, %p457_p10 }
  0x20   :  { %467 = shalt.err (!%p464_p0)
}
  0x21   :  { %50 = dma.hbm_to_vmem [thread:$0]  %s566_s4, 512, %s45_s28, [#allocation6], %s495_s21, %s495_s21, %s496_s22  }
  0x22   :  { %488 = dma.done.wait [#allocation3], 128  }
  0x23   :  { %489 = vsyncadd [#allocation3], 4294967168 }
  0x24   :  { %490 = dma.done.wait [#allocation6], 1024  }
  0x25   :  { %491 = vsyncadd [#allocation6], 4294966272  ;;  %vm61_vm0 = vcmask 261120   ;;  %v60_v0 = vld [vmem:[#allocation2] sm:$0xff]  ;;  %v499_v9 = vmov 0.0   ;;  %v94_v10 = vld [vmem:[#allocation5 + $0x10] sm:$0xff] }
  0x26   :  { %v62_v1 = vsel %vm61_vm0, %v60_v0, 0.0  ;;  %v95_v7 = vld [vmem:[#allocation5 + $0x18] sm:$0xff]  ;;  %367 = vmatprep.subr.mxu0 %v499_v9  ;;  %378 = vmatprep.subr.mxu1 %v499_v9  ;;  %v171_v11 = vld [vmem:[#allocation7 + $0x10] sm:$0xff]  ;;  %v93_v12 = vld [vmem:[#allocation5 + $0x8] sm:$0xff]  ;;  %vm500_vm1 = vmmov 0   ;;  %vm320_vm2 = vcmask 57344  }
  0x27   :  { %63 = vadd.xlane.f32.xlu0 %v62_v1  ;;  %v172_v8 = vld [vmem:[#allocation7 + $0x18] sm:$0xff]  ;;  %368 = vmatpush3.msra.mxu0 %v95_v7  ;;  %v170_v13 = vld [vmem:[#allocation7 + $0x8] sm:$0xff]  ;;  %v92_v14 = vld [vmem:[#allocation5] sm:$0xff] }
  0x28   :  { %379 = vmatpush3.msra.mxu1 %v172_v8  ;;  %369 = vmatprep.subr.mxu0 %v499_v9  ;;  %v169_v15 = vld [vmem:[#allocation7] sm:$0xff]  ;;  %v349_v20 = vld [vmem:[%s563_s1] ss:$0 sm:$0xff]  ;;  %s501_s1 = smov [#allocation8]  }
  0x29   :  { %380 = vmatprep.subr.mxu1 %v499_v9  ;;  %370 = vmatpush3.msra.mxu0 %v94_v10  ;;  %v350_v22 = vld [vmem:[%s564_s2] ss:$0 sm:$0xff]  ;;  %s339_s2 = sshll.u32 %s501_s1, 4  ;;  %s340_s2 = int_to_ptr.vmem [resolvable:$true] %s339_s2 }
  0x2a   :  { %381 = vmatpush3.msra.mxu1 %v171_v11  ;;  %371 = vmatprep.subr.mxu0 %v499_v9  ;;  %s468_s11 = scalar_lea.vmem %s340_s2, 16  ;;  %s472_s12 = scalar_lea.vmem %s340_s2, 32 }
  0x2b   :  { %382 = vmatprep.subr.mxu1 %v499_v9  ;;  %372 = vmatpush3.msra.mxu0 %v93_v12  ;;  %p469_p1 = scmp.ne.s32.totalorder %s340_s2, %s468_s11  ;;  %p473_p2 = scmp.lt.s32.totalorder %s340_s2, %s340_s2 }
  0x2c   :  { %383 = vmatpush3.msra.mxu1 %v170_v13  ;;  %373 = vmatprep.subr.mxu0 %v499_v9  ;;  %p474_p3 = scmp.lt.s32.totalorder %s472_s12, %s468_s11 }
  0x2d   :  { %384 = vmatprep.subr.mxu1 %v499_v9  ;;  %374 = vmatpush3.msra.mxu0 %v92_v14 }
  0x2e   :  { %375 = vmatprep.mubr.msk.f32.mxu0 %vm500_vm1, %v499_v9  ;;  %385 = vmatpush3.msra.mxu1 %v169_v15  ;;  %p475_p4 = por %p474_p3, %p473_p2 }
  0x2f   :  { %386 = vmatprep.mubr.msk.f32.mxu1 %vm500_vm1, %v499_v9  ;;  %389 = vmatprep.subr.mxu0 %v499_v9 }
  0x30   :  { %p476_p5 = pnand %p475_p4, %p469_p1 }
  0xb0   :  { %v64_v2 = vpop.xlane.xlu0 %63 }
  0xb1   :  { %v66_v3 = vmul.f32 0.03125, %v64_v2 }
  0xb3   :  { %v67_v4 = vsub.f32 %v60_v0, %v66_v3 }
  0xb5   :  { %v68_v5 = vmul.f32 %v67_v4, %v67_v4 }
  0xb7   :  { %v69_v6 = vsel %vm61_vm0, %v68_v5, 0.0 }
  0xb8   :  { %70 = vadd.xlane.f32.xlu0 %v69_v6 }
 0x141   :  { %v71_v16 = vpop.xlane.xlu0 %70 }
 0x142   :  { %v72_v17 = vmul.f32 0.03125, %v71_v16 }
 0x144   :  { %v73_v18 = vadd.f32 1e-05, %v72_v17 }
 0x146   :  { %402 = vrsqrt.f32 %v73_v18 }
 0x153   :  { %v403_v19 = vpop.eup %402 }
 0x154   :  { %v75_v21 = vmul.f32 %v403_v19, %v67_v4 }
 0x156   :  { %v83_v23 = vmul.f32 %v349_v20, %v75_v21 }
 0x158   :  { %v91_v24 = vadd.f32 %v350_v22, %v83_v23 }
 0x15a   :  { %376 = vmatmul.mubr.msk.f32.vlgmr.msra.gmra.mxu0 %vm61_vm0, %v91_v24  ;;  %387 = vmatmul.mubr.msk.f32.vlgmr.msra.gmra.mxu1 %vm61_vm0, %v91_v24 }
 0x15b   :  { %391 = vmatprep.mubr.msk.f32.mxu0 %vm500_vm1, %v499_v9 }
 0x21a   :  { %v165_v25 = vpop.f32.mrf.mxu0  ;;  %v239_v26 = vpop.f32.mrf.mxu1 }
 0x21b   :  { %390 = vmatpush3.xpose.msk.msra.mxu0 %vm61_vm0, %v239_v26 }
 0x21c   :  { %v377_v27 = vpop.f32.mrf.mxu0  ;;  %v388_v28 = vpop.f32.mrf.mxu1 }
 0x21e   :  { %392 = vmatmul.mubr.msk.f32.vlgmr.msra.gmra.mxu0 %vm61_vm0, %v165_v25 }
 0x2de   :  { %v315_v29 = vpop.f32.mrf.mxu0 }
 0x2df   :  { %v319_v30 = vmul.f32 0.17677669, %v315_v29 }
 0x2e0   :  { %v393_v31 = vpop.f32.mrf.mxu0 }
 0x2e1   :  { %v321_v32 = vsel %vm320_vm2, %v319_v30, -inf }
 0x2e2   :  { %322 = vmax.xlane.f32.xlu1 %v321_v32 }
 0x36b   :  { %v323_v33 = vpop.xlane.xlu1 %322 }
 0x36c   :  { %v324_v34 = vsub.f32 %v319_v30, %v323_v33 }
 0x36e   :  { %v325_v35 = vmul.f32 1.442695, %v324_v34 }
 0x370   :  { %404 = vpow2.f32 %v325_v35 }
 0x37d   :  { %v405_v36 = vpop.eup %404 }
 0x37e   :  { %v327_v37 = vsel %vm320_vm2, %v405_v36, 0.0 }
 0x37f   :  { %328 = vadd.xlane.f32.xlu1 %v327_v37 }
 0x408   :  { %v329_v38 = vpop.xlane.xlu1 %328 }
 0x409   :  { %406 = vrcp.f32 %v329_v38 }
 0x416   :  { %v407_v39 = vpop.eup %406 }
 0x417   :  { %v331_v40 = vmul.f32 %v407_v39, %v405_v36 }
 0x419   :  { %332 = vst.msk [vmem:[#allocation8] sm:$0x1] %vm320_vm2, %v331_v40 }
 0x41a   :  { %479 = shalt.err (!%p476_p5)
}
 0x41b   :  { %342 = dma.vmem_to_hbm [thread:$0]  %s340_s2, 16, %s567_s5, [#allocation4]  }
 0x41c   :  { %492 = dma.done.wait [#allocation4], 16  }
 0x41d   :  { %493 = vsyncadd [#allocation4], 4294967280 }
 0x41e   :  { %346 = vsyncpa [#allocation3], 1 }
 0x41f   :  { %347 = vsyncpa [#allocation6], 1 }
 0x420   :  { %348 = vsyncpa [#allocation4], 1 }

</bundles_post_ra>
